<compile_context>
chip_gen: v7x
topology: tpu7x:2x2x1
jax: 0.10.0
libtpu: 0.0.40
codegen_flags: <defaults>
</compile_context>

<pallas_src>
import jax
import jax.numpy as jnp
from jax import lax
from jax.experimental import pallas as pl
from jax.experimental.pallas import tpu as pltpu

LANES = 128
SUBLANES = 8


def _round_up(x, m):
    return (x + m - 1) // m * m


def vnet_kernel(x_ref, w1_ref, w2_ref, w3_ref, b_ref, out_ref):
    # Layer 1: x @ W1 + b1 ; ReLU   (bf16 MXU inputs, f32 accumulation/elementwise)
    h = jnp.dot(x_ref[...], w1_ref[...], preferred_element_type=jnp.float32)
    h = jnp.maximum(h + b_ref[0:1, :], 0.0)
    # Layer 2: h @ W2 + b2 ; ReLU
    h = jnp.dot(h.astype(w2_ref.dtype), w2_ref[...], preferred_element_type=jnp.float32)
    h = jnp.maximum(h + b_ref[1:2, :], 0.0)
    # Layer 3: output padded to 128 lanes; only column 0 carries the value.
    o = jnp.dot(h.astype(w3_ref.dtype), w3_ref[...], preferred_element_type=jnp.float32)
    o = o + b_ref[2:3, :out_ref.shape[-1]]
    out_ref[...] = o.astype(out_ref.dtype)


def init_params(key, s_dim, z_num, hidden):
    """PyTorch nn.Linear default init: U(-1/sqrt(fan_in), 1/sqrt(fan_in)).

    Weights are stored [in_features, out_features] so the kernel computes
    y = x @ W + b (transpose of PyTorch's storage, same distribution).
    """
    ks = jax.random.split(key, 6)
    d_in = s_dim + z_num

    def uni(k, shape, fan_in):
        bound = 1.0 / float(fan_in) ** 0.5
        return jax.random.uniform(k, shape, jnp.float32, -bound, bound)

    return {
        "w1": uni(ks[0], (d_in, hidden), d_in),
        "b1": uni(ks[1], (hidden,), d_in),
        "w2": uni(ks[2], (hidden, hidden), hidden),
        "b2": uni(ks[3], (hidden,), hidden),
        "w3": uni(ks[4], (hidden, 1), hidden),
        "b3": uni(ks[5], (1,), hidden),
    }


def pack_params(params, weight_dtype=jnp.bfloat16):
    """Pad feature dims to 128 lanes, cast weights to bf16, pack biases into one tile.

    Do this once and reuse across forward calls.
    """
    w1, b1 = params["w1"], params["b1"]
    w2, b2 = params["w2"], params["b2"]
    w3, b3 = params["w3"], params["b3"]
    d_in, hidden = w1.shape
    hp = _round_up(max(hidden, LANES), LANES)   # lane-padded hidden width
    out_p = LANES                               # lane-padded output width (real width = 1)

    def pad2(a, rows, cols):
        return jnp.pad(a, ((0, rows - a.shape[0]), (0, cols - a.shape[1])))

    w1p = pad2(w1, d_in, hp).astype(weight_dtype)
    w2p = pad2(w2, hp, hp).astype(weight_dtype)
    w3p = pad2(w3, hp, out_p).astype(weight_dtype)

    # Packed biases: row 0 = b1, row 1 = b2, row 2 = [b3, 0, ...]; rest zero.
    bias = jnp.zeros((SUBLANES, hp), jnp.float32)
    bias = bias.at[0, :hidden].set(b1)
    bias = bias.at[1, :hidden].set(b2)
    bias = bias.at[2, 0].set(b3[0])

    return {"w1": w1p, "w2": w2p, "w3": w3p, "bias": bias}


def vnet_forward(s, z, packed, tb=128):
    """Fused VNet forward pass. Returns (B, 1) float32."""
    w1, w2, w3, bias = packed["w1"], packed["w2"], packed["w3"], packed["bias"]
    x = jnp.concatenate([s, z], axis=-1).astype(w1.dtype)
    b, d_in = x.shape
    hp = w2.shape[0]
    out_p = w3.shape[1]

    # Batch tile: multiple of 8 sublanes; pad the batch so it divides evenly.
    tb = _round_up(max(8, min(tb, _round_up(b, SUBLANES))), SUBLANES)
    b_pad = _round_up(b, tb)
    if b_pad != b:
        x = jnp.pad(x, ((0, b_pad - b), (0, 0)))
    grid = (b_pad // tb,)

    flops = 2 * b_pad * (d_in * hp + hp * hp + hp * out_p)
    bytes_accessed = (x.size * x.dtype.itemsize
                      + w1.size * w1.dtype.itemsize
                      + w2.size * w2.dtype.itemsize
                      + w3.size * w3.dtype.itemsize
                      + bias.size * bias.dtype.itemsize
                      + b_pad * out_p * 4)

    out = pl.pallas_call(
        vnet_kernel,
        out_shape=jax.ShapeDtypeStruct((b_pad, out_p), jnp.float32),
        grid=grid,
        in_specs=[
            pl.BlockSpec((tb, d_in), lambda i: (i, 0)),       # streamed activations
            pl.BlockSpec((d_in, hp), lambda i: (0, 0)),       # VMEM-resident weights
            pl.BlockSpec((hp, hp), lambda i: (0, 0)),
            pl.BlockSpec((hp, out_p), lambda i: (0, 0)),
            pl.BlockSpec((SUBLANES, hp), lambda i: (0, 0)),   # packed biases
        ],
        out_specs=pl.BlockSpec((tb, out_p), lambda i: (i, 0)),
        compiler_params=pltpu.CompilerParams(
            dimension_semantics=("parallel",),
            vmem_limit_bytes=32 * 1024 * 1024,
        ),
        cost_estimate=pl.CostEstimate(
            flops=flops, transcendentals=0, bytes_accessed=bytes_accessed),
    )(x, w1, w2, w3, bias)

    # Drop batch padding and the 127 zero lanes of the padded output.
    return out[:b, :1]


def vnet_reference(s, z, params, compute_dtype=jnp.bfloat16):
    """Pure-JAX reference emulating the kernel's bf16-input / f32-accumulate numerics."""
    def c(a):
        return a.astype(compute_dtype).astype(jnp.float32)

    x = jnp.concatenate([s, z], axis=-1)
    h = jnp.dot(c(x), c(params["w1"]), precision=lax.Precision.HIGHEST) + params["b1"]
    h = jnp.maximum(h, 0.0)
    h = jnp.dot(c(h), c(params["w2"]), precision=lax.Precision.HIGHEST) + params["b2"]
    h = jnp.maximum(h, 0.0)
    return jnp.dot(c(h), c(params["w3"]), precision=lax.Precision.HIGHEST) + params["b3"]


if __name__ == "__main__":
    # batch deliberately not a multiple of the tile to exercise the padding path.
    batch, s_dim, z_num, hidden = 500, 16, 8, 32

    key = jax.random.PRNGKey(0)
    k_s, k_z, k_p = jax.random.split(key, 3)

    s = jax.random.normal(k_s, (batch, s_dim), jnp.float32)
    # z is typically a one-hot skill vector in DIAYN; build it deterministically.
    z_idx = jax.random.randint(k_z, (batch,), 0, z_num)
    z = jax.nn.one_hot(z_idx, z_num, dtype=jnp.float32)

    params = init_params(k_p, s_dim, z_num, hidden)
    packed = pack_params(params)          # pad / pack / cast once, reuse per call

    out = vnet_forward(s, z, packed, tb=128)
    out = jax.block_until_ready(out)

    ref = vnet_reference(s, z, params)
    assert out.shape == (batch, 1), out.shape
    assert jnp.allclose(out, ref, atol=1e-4, rtol=1e-4), float(jnp.max(jnp.abs(out - ref)))

    print("KERNEL_OK")
</pallas_src>

<mosaic_0001>
module attributes {stable_mosaic.version = 11 : i64} {
  func.func @vnet_kernel(%arg0: i32, %arg1: memref<128x24xbf16, #tpu.memory_space<vmem>>, %arg2: memref<24x128xbf16, #tpu.memory_space<vmem>>, %arg3: memref<128x128xbf16, #tpu.memory_space<vmem>>, %arg4: memref<128x128xbf16, #tpu.memory_space<vmem>>, %arg5: memref<8x128xf32, #tpu.memory_space<vmem>>, %arg6: memref<128x128xf32, #tpu.memory_space<vmem>>) attributes {dimension_semantics = [#tpu.dimension_semantics<parallel>], iteration_bounds = array<i64: 4>, scalar_prefetch = 0 : i64, scratch_operands = 0 : i64, tpu.core_type = #tpu.core_type<tc>, window_params = [{transform_indices = @transform_0, window_bounds = array<i64: 128, 24>}, {pipeline_mode = #tpu.pipeline_mode<synchronous>, transform_indices = @transform_1, window_bounds = array<i64: 24, 128>}, {pipeline_mode = #tpu.pipeline_mode<synchronous>, transform_indices = @transform_2, window_bounds = array<i64: 128, 128>}, {pipeline_mode = #tpu.pipeline_mode<synchronous>, transform_indices = @transform_3, window_bounds = array<i64: 128, 128>}, {pipeline_mode = #tpu.pipeline_mode<synchronous>, transform_indices = @transform_4, window_bounds = array<i64: 8, 128>}, {transform_indices = @transform_5, window_bounds = array<i64: 128, 128>}]} {
    %c0 = arith.constant 0 : index
    %c0_0 = arith.constant 0 : index
    %0 = vector.load %arg1[%c0, %c0_0] : memref<128x24xbf16, #tpu.memory_space<vmem>>, vector<128x24xbf16>
    %c0_1 = arith.constant 0 : index
    %c0_2 = arith.constant 0 : index
    %1 = vector.load %arg2[%c0_1, %c0_2] : memref<24x128xbf16, #tpu.memory_space<vmem>>, vector<24x128xbf16>
    %cst = arith.constant dense<0.000000e+00> : vector<128x128xf32>
    %2 = tpu.matmul %0, %1, %cst {dimension_numbers = #tpu.dot_dimension_numbers<[1], [0], [0], [1], [0, 0, 1, 1], [], []>} : vector<128x24xbf16>, vector<24x128xbf16>, vector<128x128xf32> -> vector<128x128xf32>
    %c0_3 = arith.constant 0 : index
    %c0_4 = arith.constant 0 : index
    %3 = vector.load %arg5[%c0_3, %c0_4] : memref<8x128xf32, #tpu.memory_space<vmem>>, vector<1x128xf32>
    %4 = vector.broadcast %3 : vector<1x128xf32> to vector<128x128xf32>
    %5 = arith.addf %2, %4 : vector<128x128xf32>
    %cst_5 = arith.constant 0.000000e+00 : f32
    %6 = vector.broadcast %cst_5 : f32 to vector<128x128xf32>
    %7 = arith.maximumf %5, %6 : vector<128x128xf32>
    %8 = arith.truncf %7 : vector<128x128xf32> to vector<128x128xbf16>
    %c0_6 = arith.constant 0 : index
    %c0_7 = arith.constant 0 : index
    %9 = vector.load %arg3[%c0_6, %c0_7] : memref<128x128xbf16, #tpu.memory_space<vmem>>, vector<128x128xbf16>
    %cst_8 = arith.constant dense<0.000000e+00> : vector<128x128xf32>
    %10 = tpu.matmul %8, %9, %cst_8 {dimension_numbers = #tpu.dot_dimension_numbers<[1], [0], [0], [1], [0, 0, 1, 1], [], []>} : vector<128x128xbf16>, vector<128x128xbf16>, vector<128x128xf32> -> vector<128x128xf32>
    %c1 = arith.constant 1 : index
    %c0_9 = arith.constant 0 : index
    %11 = vector.load %arg5[%c1, %c0_9] : memref<8x128xf32, #tpu.memory_space<vmem>>, vector<1x128xf32>
    %12 = vector.broadcast %11 : vector<1x128xf32> to vector<128x128xf32>
    %13 = arith.addf %10, %12 : vector<128x128xf32>
    %cst_10 = arith.constant 0.000000e+00 : f32
    %14 = vector.broadcast %cst_10 : f32 to vector<128x128xf32>
    %15 = arith.maximumf %13, %14 : vector<128x128xf32>
    %16 = arith.truncf %15 : vector<128x128xf32> to vector<128x128xbf16>
    %c0_11 = arith.constant 0 : index
    %c0_12 = arith.constant 0 : index
    %17 = vector.load %arg4[%c0_11, %c0_12] : memref<128x128xbf16, #tpu.memory_space<vmem>>, vector<128x128xbf16>
    %cst_13 = arith.constant dense<0.000000e+00> : vector<128x128xf32>
    %18 = tpu.matmul %16, %17, %cst_13 {dimension_numbers = #tpu.dot_dimension_numbers<[1], [0], [0], [1], [0, 0, 1, 1], [], []>} : vector<128x128xbf16>, vector<128x128xbf16>, vector<128x128xf32> -> vector<128x128xf32>
    %c2 = arith.constant 2 : index
    %c0_14 = arith.constant 0 : index
    %19 = vector.load %arg5[%c2, %c0_14] : memref<8x128xf32, #tpu.memory_space<vmem>>, vector<1x128xf32>
    %20 = vector.broadcast %19 : vector<1x128xf32> to vector<128x128xf32>
    %21 = arith.addf %18, %20 : vector<128x128xf32>
    %c0_15 = arith.constant 0 : index
    %c0_16 = arith.constant 0 : index
    %22 = vector.load %arg6[%c0_15, %c0_16] : memref<128x128xf32, #tpu.memory_space<vmem>>, vector<128x128xf32>
    tpu.vector_store %arg6[%c0_15, %c0_16], %21 {strides = array<i32>} : memref<128x128xf32, #tpu.memory_space<vmem>>, vector<128x128xf32>,
    return
  }
  func.func @transform_0(%arg0: i32) -> (i32, i32) {
    %c0_i32 = arith.constant 0 : i32
    %c0_i32_0 = arith.constant 0 : i32
    return %arg0, %c0_i32 : i32, i32
  }
  func.func @transform_1(%arg0: i32) -> (i32, i32) {
    %c0_i32 = arith.constant 0 : i32
    %c0_i32_0 = arith.constant 0 : i32
    %c0_i32_1 = arith.constant 0 : i32
    return %c0_i32, %c0_i32_0 : i32, i32
  }
  func.func @transform_2(%arg0: i32) -> (i32, i32) {
    %c0_i32 = arith.constant 0 : i32
    %c0_i32_0 = arith.constant 0 : i32
    %c0_i32_1 = arith.constant 0 : i32
    return %c0_i32, %c0_i32_0 : i32, i32
  }
  func.func @transform_3(%arg0: i32) -> (i32, i32) {
    %c0_i32 = arith.constant 0 : i32
    %c0_i32_0 = arith.constant 0 : i32
    %c0_i32_1 = arith.constant 0 : i32
    return %c0_i32, %c0_i32_0 : i32, i32
  }
  func.func @transform_4(%arg0: i32) -> (i32, i32) {
    %c0_i32 = arith.constant 0 : i32
    %c0_i32_0 = arith.constant 0 : i32
    %c0_i32_1 = arith.constant 0 : i32
    return %c0_i32, %c0_i32_0 : i32, i32
  }
  func.func @transform_5(%arg0: i32) -> (i32, i32) {
    %c0_i32 = arith.constant 0 : i32
    %c0_i32_0 = arith.constant 0 : i32
    return %arg0, %c0_i32 : i32, i32
  }
}

</mosaic_0001>

<bundles_post_ra>
// kernel: tpu_custom_call.1
= control target key start
LH: loop header
LB: loop body
LE: loop exit
PB: predicated region body
PF: predicated region fallthrough
CT: control target
= control target key end

     0   :  { %10 = vsyncpa [#allocation3], 0  ;;  %s1435_s0 = inlined_call_operand.vmem [shape: bf16[512,24], index: 0, kind: input, shape index: {}]   ;;  %s1436_s1 = inlined_call_operand.vmem [shape: bf16[24,128], index: 1, kind: input, shape index: {}]   ;;  %s1437_s2 = inlined_call_operand.vmem [shape: bf16[128,128], index: 2, kind: input, shape index: {}]   ;;  %s1438_s3 = inlined_call_operand.vmem [shape: bf16[128,128], index: 3, kind: input, shape index: {}]   ;;  %s1439_s4 = inlined_call_operand.vmem [shape: f32[8,128], index: 4, kind: input, shape index: {}]   ;;  %s1440_s5 = inlined_call_operand.hbm [shape: f32[512,128], index: 5, kind: output, shape index: {}]  }
   0x1   :  { %12 = vsyncpa [#allocation3 + $0x1], 0  ;;  %s1239_s18 = smov 0   ;;  %s1241_s19 = smov 0  }
   0x2   :  { %s1243_s20 = smov 0   ;;  %s1245_s21 = smov 0  }
   0x3 LB: > { %s1260_s22 = sadd.s32 4294967295, %s1204_s21   ;;  %s898_s23 = sadd.s32 4294967294, %s1204_s21   ;;  %s1204_s21 = sphi %s1245_s21, %s1446_s21   ;;  %s1200_s20 = sphi %s1243_s20, %s1445_s20   ;;  %s1196_s19 = sphi %s1241_s19, %s1444_s19   ;;  %s1192_s18 = sphi %s1239_s18, %s1443_s18  }
   0x4   : > { %s1264_s24 = sadd.s32 1, %s1204_s21   ;;  %s135_s25 = sadd.s32 1, %s1200_s20 }
   0x5   : > { %s132_s26 = ssub.s32 %s1204_s21, %s1264_s24  ;;  %p145_p0 = scmp.ne.s32.totalorder %s1200_s20, %s1196_s19 }
   0x6   : > { %p133_p1 = scmp.eq.s32.totalorder %s132_s26, 0  ;;  %p146_p2 = scmp.eq.s32.totalorder %s1260_s22, 3 }
   0x7   : > { %p151_p3 = scmp.ne.s32.totalorder %s1196_s19, %s1192_s18  ;;  %p152_p4 = scmp.eq.s32.totalorder %s898_s23, 3 }
   0x8   : > { %s1275_s27 = scalar_select %p133_p1, %s1200_s20, %s135_s25  }
   0x9   : > { %p1277_p5 = por %p146_p2, %p145_p0  ;;  %p1281_p6 = por %p152_p4, %p151_p3 }
   0xa   : > { %p901_p7 = scmp.ge.s32.totalorder %s1204_s21, 1  ;;  %p191_p8 = scmp.lt.s32.totalorder %s1204_s21, 5 }
   0xc   : > { %p192_p9 = pnand %p901_p7, %p191_p8 }
   0xd   : > { %v1116_v0 = vld [vmem:[%s1436_s1] sm:$0xff] (!%p192_p9)   ;;  %v1117_v1 = vld [vmem:[%s1436_s1 + $0x8] ss:$0 sps:$4 sm:$0xff] (!%p192_p9)   ;;  %vm325_vm0 = vcmask (!%p192_p9), 1043456   ;;  %s903_s9 = sshll.u32 (!%p192_p9), %s1260_s22, 4  ;;  %v1128_v5 = vld [vmem:[%s1437_s2 + $0x10] sm:$0xff] (!%p192_p9)  }
   0xe   : > { %195 = sbr.rel (%p192_p9) target bundleno = 726 (0x2d6), region = 40  ;;  %990 = vmatprep.subr.bf16.mxu0 (!%p192_p9), %v1116_v0  ;;  %p220_p10 = scmp.lt.s32.totalorder (!%p192_p9), %s903_s9, 63  ;;  %v1126_v2 = vld [vmem:[%s1437_s2] sm:$0xff] (!%p192_p9)   ;;  %v1127_v3 = vld [vmem:[%s1437_s2 + $0x8] sm:$0xff] (!%p192_p9)   ;;  %v327_v4 = vsel (!%p192_p9), %vm325_vm0, %v1117_v1, 0  ;;  %vm300_vm1 = vcmask (!%p192_p9), 195584  }
   0xf   : > { %991 = vmatpush3.bf16.msra.mxu0 (!%p192_p9), %v1116_v0  ;;  %1010 = vmatprep.subr.bf16.mxu1 (!%p192_p9), %v1126_v2  ;;  %v1129_v7 = vld [vmem:[%s1437_s2 + $0x18] sm:$0xff] (!%p192_p9)   ;;  %v1130_v10 = vld [vmem:[%s1437_s2 + $0x20] sm:$0xff] (!%p192_p9)   ;;  %v1131_v13 = vld [vmem:[%s1437_s2 + $0x28] sm:$0xff] (!%p192_p9)   ;;  %s216_s23 = sand.u32 (!%p192_p9), 1, %s1196_s19   ;;  %s947_s7 = sshll.u32 (!%p192_p9), %s1260_s22, 11 }
  0x10   : > { %1074 = vmatprep.subr.msk.bf16.mxu0 (!%p192_p9), %vm325_vm0, %v1117_v1  ;;  %1011 = vmatpush3.bf16.msra.mxu1 (!%p192_p9), %v1126_v2  ;;  %v1132_v17 = vld [vmem:[%s1437_s2 + $0x30] sm:$0xff] (!%p192_p9)   ;;  %v1133_v18 = vld [vmem:[%s1437_s2 + $0x38] sm:$0xff] (!%p192_p9)   ;;  %v1134_v19 = vld [vmem:[%s1438_s3] sm:$0xff] (!%p192_p9)   ;;  %s1385_s11 = scalar_lea.hbm (!%p192_p9), %s1440_s5, %s947_s7  ;;  %s1394_s22 = scalar_lea.sflag (!%p192_p9), [#allocation3], %s216_s23 }
  0x11   : > { %1012 = vmatprep.subr.bf16.mxu1 (!%p192_p9), %v1127_v3  ;;  %v1135_v20 = vld [vmem:[%s1438_s3 + $0x8] sm:$0xff] (!%p192_p9)   ;;  %v1136_v21 = vld [vmem:[%s1438_s3 + $0x10] sm:$0xff] (!%p192_p9)   ;;  %v1137_v22 = vld [vmem:[%s1438_s3 + $0x18] sm:$0xff] (!%p192_p9)   ;;  %s1206_s13 = smov (!%p192_p9), [#allocation2]  }
  0x12   : > { %v1138_v23 = vld [vmem:[%s1438_s3 + $0x20] sm:$0xff] (!%p192_p9)   ;;  %v1139_v24 = vld [vmem:[%s1438_s3 + $0x28] sm:$0xff] (!%p192_p9)  }
  0x13   : > { %993 = vmatpush3.bf16.msra.mxu0 (!%p192_p9), %v327_v4  ;;  %v905_v25 = vld [vmem:[%s1439_s4] ss:$0 sm:$0xff] (!%p192_p9) }
  0x14   : > { %1013 = vmatpush3.bf16.msra.mxu1 (!%p192_p9), %v1127_v3  ;;  %1042 = vmatprep.subr.bf16.mxu0 (!%p192_p9), %v1134_v19 }
  0x15   : > { %s1448_s9 = smov (!%p220_p10, %s903_s9), 63  ;;  %1014 = vmatprep.subr.bf16.mxu1 %v1128_v5 }
  0x16   : > { %s904_s14 = sshll.u32 %s1448_s9, 2 }
  0x17   : > { %s223_s25 = scalar_lea.vmem %s1435_s0, %s904_s14  ;;  %s1146_s14 = sshll.u32 %s1206_s13, 4  ;;  %s1147_s14 = int_to_ptr.vmem [resolvable:$false] %s1146_s14 }
  0x18   : > { %v1118_v6 = vld [vmem:[%s223_s25] sm:$0xff]   ;;  %v1119_v8 = vld [vmem:[%s223_s25 + $0x8] sm:$0xff]   ;;  %v1120_v9 = vld [vmem:[%s223_s25 + $0x10] sm:$0xff]   ;;  %1015 = vmatpush3.bf16.msra.mxu1 %v1128_v5  ;;  %s1148_s15 = scalar_lea.vmem %s1147_s14, 4096 }
  0x19   : > { %994 = vmatprep.mubr.msk.bf16.mxu0 %vm300_vm1, %v1118_v6  ;;  %v1121_v11 = vld [vmem:[%s223_s25 + $0x18] sm:$0xff]   ;;  %1016 = vmatprep.subr.bf16.mxu1 %v1129_v7  ;;  %v1122_v12 = vld [vmem:[%s223_s25 + $0x20] sm:$0xff]   ;;  %v1123_v14 = vld [vmem:[%s223_s25 + $0x28] sm:$0xff]  }
  0x1a   : > { %995 = vmatmul.mubr.msk.bf16.vlgmr.msra.gmra.mrb[0].mxu0 %vm300_vm1, %v1119_v8  ;;  %v1124_v15 = vld [vmem:[%s223_s25 + $0x30] sm:$0xff]   ;;  %v1125_v16 = vld [vmem:[%s223_s25 + $0x38] sm:$0xff]   ;;  %s902_s25 = sshll.u32 %s216_s23, 7 }
  0x1b   : > { %998 = vmatprep.mubr.msk.bf16.mxu0 %vm300_vm1, %v1120_v9  ;;  %1043 = vmatpush3.bf16.msra.mxu0 %v1134_v19  ;;  %v1141_v19 = vld [vmem:[%s1438_s3 + $0x38] sm:$0xff]   ;;  %s1365_s6 = scalar_lea.vmem [#allocation2], %s902_s25 }
  0x1c   : > { %1017 = vmatpush3.bf16.msra.mxu1 %v1129_v7  ;;  %1044 = vmatprep.subr.bf16.mxu0 %v1135_v20  ;;  %s836_s8 = sshll.u32 %s1365_s6, 4  ;;  %s1387_s8 = int_to_ptr.vmem [resolvable:$true] %s836_s8 }
  0x1d   : > { %1018 = vmatprep.subr.bf16.mxu1 %v1130_v10  ;;  %s1142_s12 = scalar_lea.vmem %s1387_s8, 2048  ;;  %p1149_p0 = scmp.lt.s32.totalorder %s1387_s8, %s1147_s14 }
  0x1e   : > { %p1143_p11 = scmp.ne.s32.totalorder %s1387_s8, %s1142_s12  ;;  %p1150_p1 = scmp.lt.s32.totalorder %s1148_s15, %s1142_s12 }
  0x1f   : > { %1045 = vmatpush3.bf16.msra.mxu0 %v1135_v20  ;;  %v924_v20 = vld [vmem:[%s1439_s4 + $0x1] ss:$0 sm:$0xff] }
  0x20   : > { %1019 = vmatpush3.bf16.msra.mxu1 %v1130_v10  ;;  %1046 = vmatprep.subr.bf16.mxu0 %v1136_v21  ;;  %p1144_p12 = pnand %p1143_p11, %p1277_p5  ;;  %p1151_p2 = por %p1150_p1, %p1149_p0 }
  0x21   : > { %1020 = vmatprep.subr.bf16.mxu1 %v1131_v13 }
  0x22   : > { %999 = vmatmul.mubr.msk.bf16.gmra.mrb[4].mxu0 %vm300_vm1, %v1121_v11  ;;  %p1145_p13 = pneg %p1144_p12 }
  0x23   : > { %1002 = vmatprep.mubr.msk.bf16.mxu0 %vm300_vm1, %v1122_v12  ;;  %1047 = vmatpush3.bf16.msra.mxu0 %v1136_v21 }
  0x24   : > { %1021 = vmatpush3.bf16.msra.mxu1 %v1131_v13  ;;  %1048 = vmatprep.subr.bf16.mxu0 %v1137_v22  ;;  %p1152_p3 = pnand %p1151_p2, %p1145_p13 }
  0x25   : > { %1022 = vmatprep.subr.bf16.mxu1 %v1132_v17 }
  0x27   : > { %1049 = vmatpush3.bf16.msra.mxu0 %v1137_v22 }
  0x28   : > { %1023 = vmatpush3.bf16.msra.mxu1 %v1132_v17  ;;  %1050 = vmatprep.subr.bf16.mxu0 %v1138_v23 }
  0x29   : > { %1024 = vmatprep.subr.bf16.mxu1 %v1133_v18 }
  0x2a   : > { %1003 = vmatmul.mubr.msk.bf16.gmra.mrb[8].mxu0 %vm300_vm1, %v1123_v14 }
  0x2b   : > { %1006 = vmatprep.mubr.msk.bf16.mxu0 %vm300_vm1, %v1124_v15  ;;  %1051 = vmatpush3.bf16.msra.mxu0 %v1138_v23 }
  0x2c   : > { %1025 = vmatpush3.bf16.msra.mxu1 %v1133_v18  ;;  %1052 = vmatprep.subr.bf16.mxu0 %v1139_v24  ;;  %v1140_v18 = vld [vmem:[%s1438_s3 + $0x30] sm:$0xff]  }
  0x2f   : > { %1053 = vmatpush3.bf16.msra.mxu0 %v1139_v24 }
  0x30   : > { %1054 = vmatprep.subr.bf16.mxu0 %v1140_v18 }
  0x32   : > { %1007 = vmatmul.mubr.msk.bf16.gmra.mrb[12].mxu0 %vm300_vm1, %v1125_v16 }
  0x33   : > { %1055 = vmatpush3.bf16.msra.mxu0 %v1140_v18 }
  0x34   : > { %1056 = vmatprep.subr.bf16.mxu0 %v1141_v19 }
  0x37   : > { %1057 = vmatpush3.bf16.msra.mxu0 %v1141_v19 }
  0xed   : > { %v996_v26 = vpop.f32.mrb[0].mxu0 }
  0xee   : > { %v372_v27 = vadd.f32 %v996_v26, %v905_v25  ;;  %v363_v28 = vpop.f32.mrb[1].mxu0 }
  0xef   : > { %v364_v29 = vadd.f32 %v905_v25, %v363_v28  ;;  %v997_v30 = vpop.f32.mrb[2].mxu0 }
  0xf0   : > { %v375_v31 = vadd.f32 %v997_v30, %v905_v25  ;;  %v366_v32 = vpop.f32.mrb[3].mxu0  ;;  %v428_v34 = vmax.f32 %v372_v27, 0.0 }
  0xf1   : > { %v367_v33 = vadd.f32 %v905_v25, %v366_v32  ;;  %v426_v36 = vmax.f32 %v364_v29, 0.0 }
  0xf2   : > { %v429_v35 = vmax.f32 %v375_v31, 0.0 }
  0xf3   : > { %v427_v37 = vmax.f32 %v367_v33, 0.0 }
  0xf4   : > { %v443_v38 = vpack.c.bf16 %v429_v35, %v428_v34 }
  0xf5   : > { %v1000_v39 = vpop.f32.mrb[4].mxu0  ;;  %v442_v40 = vpack.c.bf16 %v427_v37, %v426_v36 }
  0xf6   : > { %v388_v41 = vadd.f32 %v1000_v39, %v905_v25  ;;  %v379_v42 = vpop.f32.mrb[5].mxu0 }
  0xf7   : > { %v380_v43 = vadd.f32 %v905_v25, %v379_v42  ;;  %v1001_v44 = vpop.f32.mrb[6].mxu0  ;;  %1026 = vmatprep.mubr.bf16.mxu1 %v442_v40 }
  0xf8   : > { %v391_v45 = vadd.f32 %v1001_v44, %v905_v25  ;;  %v382_v46 = vpop.f32.mrb[7].mxu0  ;;  %1027 = vmatmul.mubr.bf16.vlgmr.msra.gmra.mrb[0].mxu1 %v443_v38  ;;  %v432_v48 = vmax.f32 %v388_v41, 0.0 }
  0xf9   : > { %v383_v47 = vadd.f32 %v905_v25, %v382_v46  ;;  %v430_v50 = vmax.f32 %v380_v43, 0.0 }
  0xfa   : > { %v433_v49 = vmax.f32 %v391_v45, 0.0 }
  0xfb   : > { %v431_v51 = vmax.f32 %v383_v47, 0.0 }
  0xfc   : > { %v445_v52 = vpack.c.bf16 %v433_v49, %v432_v48 }
  0xfd   : > { %v444_v53 = vpack.c.bf16 %v431_v51, %v430_v50  ;;  %v1004_v54 = vpop.f32.mrb[8].mxu0 }
  0xfe   : > { %v404_v55 = vadd.f32 %v1004_v54, %v905_v25  ;;  %v395_v56 = vpop.f32.mrb[9].mxu0 }
  0xff   : > { %v396_v57 = vadd.f32 %v905_v25, %v395_v56  ;;  %v1005_v58 = vpop.f32.mrb[10].mxu0  ;;  %1030 = vmatprep.mubr.bf16.mxu1 %v444_v53 }
 0x100   : > { %v407_v59 = vadd.f32 %v1005_v58, %v905_v25  ;;  %v398_v60 = vpop.f32.mrb[11].mxu0  ;;  %1031 = vmatmul.mubr.bf16.gmra.mrb[4].mxu1 %v445_v52  ;;  %v436_v62 = vmax.f32 %v404_v55, 0.0 }
 0x101   : > { %v399_v61 = vadd.f32 %v905_v25, %v398_v60  ;;  %v434_v0 = vmax.f32 %v396_v57, 0.0 }
 0x102   : > { %v437_v63 = vmax.f32 %v407_v59, 0.0 }
 0x103   : > { %v435_v1 = vmax.f32 %v399_v61, 0.0 }
 0x104   : > { %v447_v2 = vpack.c.bf16 %v437_v63, %v436_v62 }
 0x105   : > { %v446_v3 = vpack.c.bf16 %v435_v1, %v434_v0  ;;  %v1008_v4 = vpop.f32.mrb[12].mxu0 }
 0x106   : > { %v420_v5 = vadd.f32 %v1008_v4, %v905_v25  ;;  %v411_v6 = vpop.f32.mrb[13].mxu0 }
 0x107   : > { %v412_v7 = vadd.f32 %v905_v25, %v411_v6  ;;  %v1009_v8 = vpop.f32.mrb[14].mxu0  ;;  %1034 = vmatprep.mubr.bf16.mxu1 %v446_v3 }
 0x108   : > { %v423_v9 = vadd.f32 %v1009_v8, %v905_v25  ;;  %v414_v10 = vpop.f32.mrb[15].mxu0  ;;  %1035 = vmatmul.mubr.bf16.gmra.mrb[8].mxu1 %v447_v2  ;;  %v440_v12 = vmax.f32 %v420_v5, 0.0 }
 0x109   : > { %v415_v11 = vadd.f32 %v905_v25, %v414_v10  ;;  %v438_v14 = vmax.f32 %v412_v7, 0.0 }
 0x10a   : > { %v441_v13 = vmax.f32 %v423_v9, 0.0 }
 0x10b   : > { %v439_v15 = vmax.f32 %v415_v11, 0.0 }
 0x10c   : > { %v449_v16 = vpack.c.bf16 %v441_v13, %v440_v12  ;;  %v933_v13 = vld [vmem:[%s1439_s4 + $0x2] ss:$0 sm:$0xff] }
 0x10d   : > { %v448_v17 = vpack.c.bf16 %v439_v15, %v438_v14 }
 0x10f   : > { %1038 = vmatprep.mubr.bf16.mxu1 %v448_v17 }
 0x110   : > { %1039 = vmatmul.mubr.bf16.gmra.mrb[12].mxu1 %v449_v16 }
 0x1cb   : > { %v1028_v21 = vpop.f32.mrb[0].mxu1 }
 0x1cc   : > { %v562_v22 = vadd.f32 %v1028_v21, %v924_v20  ;;  %v553_v23 = vpop.f32.mrb[1].mxu1 }
 0x1cd   : > { %v554_v24 = vadd.f32 %v924_v20, %v553_v23  ;;  %v1029_v25 = vpop.f32.mrb[2].mxu1 }
 0x1ce   : > { %v565_v26 = vadd.f32 %v1029_v25, %v924_v20  ;;  %v556_v27 = vpop.f32.mrb[3].mxu1  ;;  %v618_v29 = vmax.f32 %v562_v22, 0.0 }
 0x1cf   : > { %v557_v28 = vadd.f32 %v924_v20, %v556_v27  ;;  %v616_v31 = vmax.f32 %v554_v24, 0.0 }
 0x1d0   : > { %v619_v30 = vmax.f32 %v565_v26, 0.0 }
 0x1d1   : > { %v617_v32 = vmax.f32 %v557_v28, 0.0 }
 0x1d2   : > { %v633_v33 = vpack.c.bf16 %v619_v30, %v618_v29 }
 0x1d3   : > { %v632_v34 = vpack.c.bf16 %v617_v32, %v616_v31  ;;  %v1032_v35 = vpop.f32.mrb[4].mxu1 }
 0x1d4   : > { %v578_v36 = vadd.f32 %v1032_v35, %v924_v20  ;;  %v569_v37 = vpop.f32.mrb[5].mxu1 }
 0x1d5   : > { %v570_v38 = vadd.f32 %v924_v20, %v569_v37  ;;  %v1033_v39 = vpop.f32.mrb[6].mxu1  ;;  %1058 = vmatprep.mubr.bf16.mxu0 %v632_v34 }
 0x1d6   : > { %v581_v40 = vadd.f32 %v1033_v39, %v924_v20  ;;  %v572_v41 = vpop.f32.mrb[7].mxu1  ;;  %1059 = vmatmul.mubr.bf16.vlgmr.msra.gmra.mrb[16].mxu0 %v633_v33  ;;  %v622_v43 = vmax.f32 %v578_v36, 0.0 }
 0x1d7   : > { %v573_v42 = vadd.f32 %v924_v20, %v572_v41  ;;  %v620_v45 = vmax.f32 %v570_v38, 0.0 }
 0x1d8   : > { %v623_v44 = vmax.f32 %v581_v40, 0.0 }
 0x1d9   : > { %v621_v46 = vmax.f32 %v573_v42, 0.0 }
 0x1da   : > { %v635_v47 = vpack.c.bf16 %v623_v44, %v622_v43 }
 0x1db   : > { %v634_v48 = vpack.c.bf16 %v621_v46, %v620_v45  ;;  %v1036_v49 = vpop.f32.mrb[8].mxu1 }
 0x1dc   : > { %v594_v50 = vadd.f32 %v1036_v49, %v924_v20  ;;  %v585_v51 = vpop.f32.mrb[9].mxu1 }
 0x1dd   : > { %v586_v52 = vadd.f32 %v924_v20, %v585_v51  ;;  %v1037_v53 = vpop.f32.mrb[10].mxu1  ;;  %1062 = vmatprep.mubr.bf16.mxu0 %v634_v48 }
 0x1de   : > { %v597_v54 = vadd.f32 %v1037_v53, %v924_v20  ;;  %v588_v55 = vpop.f32.mrb[11].mxu1  ;;  %1063 = vmatmul.mubr.bf16.gmra.mrb[20].mxu0 %v635_v47  ;;  %v626_v57 = vmax.f32 %v594_v50, 0.0 }
 0x1df   : > { %v589_v56 = vadd.f32 %v924_v20, %v588_v55  ;;  %v624_v59 = vmax.f32 %v586_v52, 0.0 }
 0x1e0   : > { %v627_v58 = vmax.f32 %v597_v54, 0.0 }
 0x1e1   : > { %v625_v60 = vmax.f32 %v589_v56, 0.0 }
 0x1e2   : > { %v637_v61 = vpack.c.bf16 %v627_v58, %v626_v57 }
 0x1e3   : > { %v636_v62 = vpack.c.bf16 %v625_v60, %v624_v59  ;;  %v1040_v63 = vpop.f32.mrb[12].mxu1 }
 0x1e4   : > { %v610_v0 = vadd.f32 %v1040_v63, %v924_v20  ;;  %v601_v1 = vpop.f32.mrb[13].mxu1 }
 0x1e5   : > { %v602_v2 = vadd.f32 %v924_v20, %v601_v1  ;;  %v1041_v3 = vpop.f32.mrb[14].mxu1  ;;  %1066 = vmatprep.mubr.bf16.mxu0 %v636_v62 }
 0x1e6   : > { %v613_v4 = vadd.f32 %v1041_v3, %v924_v20  ;;  %v604_v5 = vpop.f32.mrb[15].mxu1  ;;  %1067 = vmatmul.mubr.bf16.gmra.mrb[24].mxu0 %v637_v61  ;;  %v630_v7 = vmax.f32 %v610_v0, 0.0 }
 0x1e7   : > { %v605_v6 = vadd.f32 %v924_v20, %v604_v5  ;;  %v628_v9 = vmax.f32 %v602_v2, 0.0 }
 0x1e8   : > { %v631_v8 = vmax.f32 %v613_v4, 0.0 }
 0x1e9   : > { %v629_v10 = vmax.f32 %v605_v6, 0.0 }
 0x1ea   : > { %v639_v11 = vpack.c.bf16 %v631_v8, %v630_v7 }
 0x1eb   : > { %v638_v12 = vpack.c.bf16 %v629_v10, %v628_v9 }
 0x1ed   : > { %1070 = vmatprep.mubr.bf16.mxu0 %v638_v12 }
 0x1ee   : > { %1071 = vmatmul.mubr.bf16.gmra.mrb[28].mxu0 %v639_v11 }
 0x2a9   : > { %v1060_v14 = vpop.f32.mrb[16].mxu0 }
 0x2aa   : > { %v752_v15 = vadd.f32 %v1060_v14, %v933_v13  ;;  %v743_v16 = vpop.f32.mrb[17].mxu0 }
 0x2ab   : > { %v744_v17 = vadd.f32 %v933_v13, %v743_v16  ;;  %v1061_v18 = vpop.f32.mrb[18].mxu0 }
 0x2ac   : > { %808 = vst [vmem:[%s1365_s6 + $0x10] sm:$0xff] %v752_v15  ;;  %v755_v19 = vadd.f32 %v1061_v18, %v933_v13  ;;  %v746_v20 = vpop.f32.mrb[19].mxu0 }
 0x2ad   : > { %806 = vst [vmem:[%s1365_s6] sm:$0xff] %v744_v17  ;;  %v747_v21 = vadd.f32 %v933_v13, %v746_v20 }
 0x2ae   : > { %809 = vst [vmem:[%s1365_s6 + $0x18] sm:$0xff] %v755_v19 }
 0x2af   : > { %807 = vst [vmem:[%s1365_s6 + $0x8] sm:$0xff] %v747_v21 }
 0x2b1   : > { %v1064_v22 = vpop.f32.mrb[20].mxu0 }
 0x2b2   : > { %v768_v23 = vadd.f32 %v1064_v22, %v933_v13  ;;  %v759_v24 = vpop.f32.mrb[21].mxu0 }
 0x2b3   : > { %v760_v25 = vadd.f32 %v933_v13, %v759_v24  ;;  %v1065_v26 = vpop.f32.mrb[22].mxu0 }
 0x2b4   : > { %812 = vst [vmem:[%s1365_s6 + $0x30] sm:$0xff] %v768_v23  ;;  %v771_v27 = vadd.f32 %v1065_v26, %v933_v13  ;;  %v762_v28 = vpop.f32.mrb[23].mxu0 }
 0x2b5   : > { %810 = vst [vmem:[%s1365_s6 + $0x20] sm:$0xff] %v760_v25  ;;  %v763_v29 = vadd.f32 %v933_v13, %v762_v28 }
 0x2b6   : > { %813 = vst [vmem:[%s1365_s6 + $0x38] sm:$0xff] %v771_v27 }
 0x2b7   : > { %811 = vst [vmem:[%s1365_s6 + $0x28] sm:$0xff] %v763_v29 }
 0x2b9   : > { %v1068_v30 = vpop.f32.mrb[24].mxu0 }
 0x2ba   : > { %v784_v31 = vadd.f32 %v1068_v30, %v933_v13  ;;  %v775_v32 = vpop.f32.mrb[25].mxu0 }
 0x2bb   : > { %v776_v33 = vadd.f32 %v933_v13, %v775_v32  ;;  %v1069_v34 = vpop.f32.mrb[26].mxu0 }
 0x2bc   : > { %816 = vst [vmem:[%s1365_s6 + $0x50] sm:$0xff] %v784_v31  ;;  %v787_v35 = vadd.f32 %v1069_v34, %v933_v13  ;;  %v778_v36 = vpop.f32.mrb[27].mxu0 }
 0x2bd   : > { %814 = vst [vmem:[%s1365_s6 + $0x40] sm:$0xff] %v776_v33  ;;  %v779_v37 = vadd.f32 %v933_v13, %v778_v36 }
 0x2be   : > { %817 = vst [vmem:[%s1365_s6 + $0x58] sm:$0xff] %v787_v35 }
 0x2bf   : > { %815 = vst [vmem:[%s1365_s6 + $0x48] sm:$0xff] %v779_v37 }
 0x2c1   : > { %v1072_v38 = vpop.f32.mrb[28].mxu0 }
 0x2c2   : > { %v800_v39 = vadd.f32 %v1072_v38, %v933_v13  ;;  %v791_v40 = vpop.f32.mrb[29].mxu0 }
 0x2c3   : > { %v792_v41 = vadd.f32 %v933_v13, %v791_v40  ;;  %v1073_v42 = vpop.f32.mrb[30].mxu0 }
 0x2c4   : > { %820 = vst [vmem:[%s1365_s6 + $0x70] sm:$0xff] %v800_v39  ;;  %v803_v43 = vadd.f32 %v1073_v42, %v933_v13  ;;  %v794_v44 = vpop.f32.mrb[31].mxu0 }
 0x2c5   : > { %818 = vst [vmem:[%s1365_s6 + $0x60] sm:$0xff] %v792_v41  ;;  %v795_v45 = vadd.f32 %v933_v13, %v794_v44 }
 0x2c6   : > { %821 = vst [vmem:[%s1365_s6 + $0x78] sm:$0xff] %v803_v43 }
 0x2c7   : > { %819 = vst [vmem:[%s1365_s6 + $0x68] sm:$0xff] %v795_v45 }
 0x2c8   : > { %1155 = shalt.err (!%p1152_p3)
}
 0x2c9   : > { %s1156_s16 = scalar_lea.hbm %s1385_s11, 2048  ;;  %s1160_s25 = scalar_lea.hbm %s1440_s5, 8192 }
 0x2ca   : > { %p1157_p4 = scmp.ne.s32.totalorder %s1385_s11, %s1156_s16  ;;  %p1161_p9 = scmp.lt.u32.totalorder %s1385_s11, %s1440_s5 }
 0x2cb   : > { %p1162_p10 = scmp.lt.u32.totalorder %s1160_s25, %s1156_s16  ;;  %p1164_p12 = scmp.lt.u32.totalorder %s1156_s16, %s1385_s11 }
 0x2cc   : > { %p1158_p7 = pnand %p1157_p4, %p1277_p5 }
 0x2cd   : > { %p1163_p11 = por %p1162_p10, %p1161_p9 }
 0x2ce   : > { %p1159_p8 = pneg %p1158_p7 }
 0x2cf   : > { %p1165_p13 = por %p1164_p12, %p1163_p11 }
 0x2d1   : > { %p1166_p0 = pnand %p1165_p13, %p1159_p8 }
 0x2d3   : > { %1169 = shalt.err (!%p1166_p0)
}
 0x2d4   : > { %s1207_s6 = smov 128   ;;  %s1208_s7 = smov 8  }
 0x2d5   : > { %1075 = dma.vmem_to_hbm [thread:$0]  (%p1277_p5), %s1387_s8, 2048, %s1385_s11, %s1394_s22, %s1207_s6, %s1207_s6, %s1208_s7  }
 0x2d6 PF: > { %p1081_p1 = scmp.ge.s32.totalorder %s1204_s21, 2  ;;  %s851_s9 = sand.u32 1, %s1192_s18  }
 0x2d7   : > { %s852_s10 = scalar_lea.sflag [#allocation3], %s851_s9 }
 0x2d8   : > { %p1078_p2 = pnand %p1081_p1, %p1281_p6 }
 0x2da   : > { %1187 = dma.done.wait (!%p1078_p2), %s852_s10, 2048  }
 0x2db   : > { %1189 = vsyncadd (!%p1078_p2), %s852_s10, 4294965248  ;;  %p15_p3 = scmp.ge.s32.totalorder %s1264_s24, 6   ;;  %s1443_s18 = smov %s1196_s19 }
 0x2dc   : > { %s1444_s19 = smov %s1200_s20  ;;  %s1445_s20 = smov %s1275_s27 }
 0x2dd   : > { %s1446_s21 = smov %s1264_s24  ;;  %17 = sbr.rel (!%p15_p3) target bundleno = 3 (0x3), region = 75 }
 0x2e4   :  { %857 = vsyncpa [#allocation3], 1 }
 0x2e5   :  { %859 = vsyncpa [#allocation3 + $0x1], 1 }

</bundles_post_ra>
